<compile_context>
chip_gen: v7x
topology: tpu7x:2x2x1
jax: 0.10.0
libtpu: 0.0.40
codegen_flags: <defaults>
</compile_context>

<pallas_src>
import functools

import jax
import jax.numpy as jnp
from jax import lax
from jax.experimental import pallas as pl
from jax.experimental.pallas import tpu as pltpu

LANE = 128       # vreg lane width (last dim)
ACC_ROWS = 64    # rows of the lane-resident partial-sum accumulator


def _cdiv(a, b):
    return (a + b - 1) // b


def _round_up(a, m):
    return _cdiv(a, m) * m


def _chip_defaults():
    """(ncores, tm) tuned per TPU generation; conservative for unknown chips."""
    try:
        kind = jax.devices()[0].device_kind.lower()
    except Exception:
        kind = ""
    is_v7 = "v7" in kind
    is_v5e = ("v5e" in kind) or ("v5 lite" in kind) or ("v5lite" in kind)
    ncores = 2 if is_v7 else 1           # 2-wide parallel axis only on 2-TC chips
    tm = 4096 if is_v5e else 8192        # ~8 / ~16 MiB double-buffered working set
    return ncores, tm


def _focal_loss_kernel(x_ref, t_ref, o_ref, *, gamma, alpha, tm, steps,
                       nblocks, full_rows, rem, needs_mask):
    c = pl.program_id(0)        # core / parallel axis
    i = pl.program_id(1)        # reduction axis
    blk = c * steps + i         # logical row-block index

    @pl.when(i == 0)
    def _():
        o_ref[...] = jnp.zeros_like(o_ref)

    x = x_ref[...].astype(jnp.float32)
    t = t_ref[...].astype(jnp.float32)

    # Numerically-stable BCE-with-logits (same formula PyTorch uses):
    #   max(x, 0) - x*t + log1p(exp(-|x|))
    bce = jnp.maximum(x, 0.0) - x * t + jnp.log1p(jnp.exp(-jnp.abs(x)))
    pt = jnp.exp(-bce)

    # Trace-time specialization of the modulating factor (1 - pt)**gamma.
    g = float(gamma)
    if g == 0.0:
        f_loss = bce
    elif g.is_integer() and g > 0:
        one_minus_pt = 1.0 - pt
        mod = one_minus_pt
        for _ in range(int(g) - 1):
            mod = mod * one_minus_pt
        f_loss = mod * bce
    else:
        f_loss = (1.0 - pt) ** g * bce
    if float(alpha) != 1.0:
        f_loss = f_loss * float(alpha)

    def accumulate(v):
        # Sublane-group partial reduction into the wide lane-resident output
        # block (pure VPU adds; ACC_ROWS-wide target keeps the dependent
        # add chain short).
        o_ref[0, :, :] += jnp.sum(v.reshape(tm // ACC_ROWS, ACC_ROWS, LANE),
                                  axis=0)

    def mask_edge(v):
        # Row-granular validity (no flat 32-bit index), plus a lane mask only
        # for the single partial 128-wide row (if any).
        row = blk * tm + lax.broadcasted_iota(jnp.int32, (tm, 1), 0)
        valid = row < full_rows
        if rem:
            lane = lax.broadcasted_iota(jnp.int32, (1, LANE), 1)
            valid = valid | ((row == full_rows) & (lane < rem))
        return jnp.where(valid, v, 0.0)

    if not needs_mask:
        accumulate(f_loss)
    elif nblocks == 1:
        accumulate(mask_edge(f_loss))
    else:
        # Only the final (edge) block can contain implicit-pad rows / a partial
        # row; every other step takes the pure, unmasked path.
        @pl.when(blk < nblocks - 1)
        def _():
            accumulate(f_loss)

        @pl.when(blk >= nblocks - 1)
        def _():
            accumulate(mask_edge(f_loss))


def focal_loss(logits, targets, *, gamma=2.0, alpha=1.0, tm=None, ncores=None):
    """Focal loss with mean reduction. logits/targets: any matching shape.

    Inputs may be f32 or bf16 (bf16 halves HBM traffic; the kernel upcasts to
    f32 internally) -- cast at the caller if the quantization is acceptable.
    """
    assert logits.shape == targets.shape
    n = int(logits.size)
    assert n > 0
    rows = _cdiv(n, LANE)
    rem = n % LANE                       # valid lanes of the last 128-wide row
    full_rows = rows if rem == 0 else rows - 1

    auto_cores, auto_tm = _chip_defaults()
    ncores = auto_cores if ncores is None else int(ncores)
    tm = auto_tm if tm is None else int(tm)
    # Block row count: big enough to amortize per-step pipeline overhead, never
    # larger than one core's share, always a multiple of ACC_ROWS (which is a
    # multiple of every dtype's sublane tile: 8/16/32).
    tm = max(ACC_ROWS, min(tm, _round_up(_cdiv(rows, ncores), ACC_ROWS)))

    nblocks = _cdiv(rows, tm)
    steps = _cdiv(nblocks, ncores)
    needs_mask = (rem != 0) or (rows % tm != 0) or (ncores * steps != nblocks)

    def prep(a):
        flat = a.reshape(-1)             # free (bitcast) for contiguous inputs
        pad = rows * LANE - n
        if pad:
            # TODO(synk): the rare lane-tail case (n % 128 != 0) still pays one
            # XLA pad copy; a fully copy-free path would need a separate scalar
            # tail reduction.
            flat = jnp.pad(flat, (0, pad))
        return flat.reshape(rows, LANE)  # no row padding: Pallas pads the edge block

    x2 = prep(logits)
    t2 = prep(targets)

    kernel = functools.partial(
        _focal_loss_kernel,
        gamma=float(gamma), alpha=float(alpha),
        tm=tm, steps=steps, nblocks=nblocks,
        full_rows=full_rows, rem=rem, needs_mask=needs_mask,
    )

    def in_map(c, i):
        # Clamp phantom trailing blocks (only possible when ncores > 1 and
        # nblocks % ncores != 0); their contribution is zeroed by the mask.
        return (jnp.minimum(c * steps + i, nblocks - 1), 0)

    elems = ncores * steps * tm * LANE
    in_bytes = rows * LANE * (x2.dtype.itemsize + t2.dtype.itemsize)
    out_bytes = ncores * ACC_ROWS * LANE * 4
    cost = pl.CostEstimate(
        flops=10 * elems,
        transcendentals=3 * elems,       # exp(-|x|), log1p, exp(-bce)
        bytes_accessed=in_bytes + out_bytes,
    )

    # Double-buffered inputs + resident output block, plus headroom.
    vmem_needed = (2 * tm * LANE * (x2.dtype.itemsize + t2.dtype.itemsize)
                   + 2 * ACC_ROWS * LANE * 4)
    vmem_limit = min(max(32 << 20, vmem_needed + (8 << 20)), 48 << 20)

    partials = pl.pallas_call(
        kernel,
        out_shape=jax.ShapeDtypeStruct((ncores, ACC_ROWS, LANE), jnp.float32),
        grid_spec=pltpu.PrefetchScalarGridSpec(
            num_scalar_prefetch=0,
            grid=(ncores, steps),
            in_specs=[
                pl.BlockSpec((tm, LANE), in_map),
                pl.BlockSpec((tm, LANE), in_map),
            ],
            out_specs=pl.BlockSpec((1, ACC_ROWS, LANE), lambda c, i: (c, 0, 0)),
        ),
        compiler_params=pltpu.CompilerParams(
            dimension_semantics=("parallel", "arbitrary"),
            vmem_limit_bytes=vmem_limit,
        ),
        cost_estimate=cost,
    )(x2, t2)

    # Tiny (ncores, 64, 128) cross-lane finish + 1/N in JAX.
    return (jnp.sum(partials) / float(n)).astype(jnp.float32)


def focal_loss_ref(logits, targets, gamma=2.0, alpha=1.0):
    x = logits.astype(jnp.float32)
    t = targets.astype(jnp.float32)
    bce = jnp.maximum(x, 0.0) - x * t + jnp.log1p(jnp.exp(-jnp.abs(x)))
    pt = jnp.exp(-bce)
    return jnp.mean(alpha * (1.0 - pt) ** gamma * bce)


if __name__ == "__main__":
    # Module parameters from __init__: gamma=2, alpha=1.0.
    gamma, alpha = 2.0, 1.0

    key = jax.random.PRNGKey(0)
    k1, k2 = jax.random.split(key)

    # NCHW heatmap-style shape: batch=2, channels=4, spatial=16x16.
    shape = (2, 4, 16, 16)
    logits = jax.random.normal(k1, shape, dtype=jnp.float32)
    targets = jax.random.uniform(k2, shape, dtype=jnp.float32)  # soft targets in [0,1]
    out = jax.block_until_ready(focal_loss(logits, targets, gamma=gamma, alpha=alpha))
    ref = focal_loss_ref(logits, targets, gamma, alpha)
    assert jnp.allclose(out, ref, rtol=1e-5, atol=1e-6), (out, ref)

    # Lane-tail (n % 128 != 0) masked path.
    shape2 = (2, 3, 13, 17)
    l2 = jax.random.normal(k1, shape2, dtype=jnp.float32)
    t2 = jax.random.uniform(k2, shape2, dtype=jnp.float32)
    out2 = jax.block_until_ready(focal_loss(l2, t2, gamma=gamma, alpha=alpha))
    ref2 = focal_loss_ref(l2, t2, gamma, alpha)
    assert jnp.allclose(out2, ref2, rtol=1e-5, atol=1e-6), (out2, ref2)

    # Multi-block reduction path, no edge mask (rows divisible by tm override).
    shape3 = (2, 4, 64, 64)
    l3 = jax.random.normal(k1, shape3, dtype=jnp.float32)
    t3 = jax.random.uniform(k2, shape3, dtype=jnp.float32)
    out3 = jax.block_until_ready(focal_loss(l3, t3, gamma=gamma, alpha=alpha, tm=64))
    ref3 = focal_loss_ref(l3, t3, gamma, alpha)
    assert jnp.allclose(out3, ref3, rtol=1e-5, atol=1e-6), (out3, ref3)

    # Multi-block reduction path with a partial (masked) edge block.
    shape4 = (2, 4, 60, 64)
    l4 = jax.random.normal(k1, shape4, dtype=jnp.float32)
    t4 = jax.random.uniform(k2, shape4, dtype=jnp.float32)
    out4 = jax.block_until_ready(focal_loss(l4, t4, gamma=gamma, alpha=alpha, tm=64))
    ref4 = focal_loss_ref(l4, t4, gamma, alpha)
    assert jnp.allclose(out4, ref4, rtol=1e-5, atol=1e-6), (out4, ref4)

    print("KERNEL_OK")
</pallas_src>

<mosaic_0001>
module attributes {stable_mosaic.version = 11 : i64} {
  func.func @_focal_loss_kernel(%arg0: i32, %arg1: i32, %arg2: memref<64x128xf32, #tpu.memory_space<vmem>>, %arg3: memref<64x128xf32, #tpu.memory_space<vmem>>, %arg4: memref<1x64x128xf32, #tpu.memory_space<vmem>>) attributes {dimension_semantics = [#tpu.dimension_semantics<parallel>, #tpu.dimension_semantics<arbitrary>], iteration_bounds = array<i64: 1, 1>, scalar_prefetch = 0 : i64, scratch_operands = 0 : i64, tpu.core_type = #tpu.core_type<tc>, window_params = [{transform_indices = @transform_0, window_bounds = array<i64: 64, 128>}, {transform_indices = @transform_1, window_bounds = array<i64: 64, 128>}, {transform_indices = @transform_2, window_bounds = array<i64: 1, 64, 128>}]} {
    %c1_i32 = arith.constant 1 : i32
    %0 = arith.muli %arg0, %c1_i32 : i32
    %1 = arith.addi %0, %arg1 : i32
    %c0_i32 = arith.constant 0 : i32
    %2 = arith.cmpi eq, %arg1, %c0_i32 : i32
    %3 = arith.extui %2 : i1 to i32
    %c0_i32_0 = arith.constant 0 : i32
    %4 = arith.cmpi ne, %3, %c0_i32_0 : i32
    scf.if %4 {
      %cst_15 = arith.constant 0.000000e+00 : f32
      %42 = vector.broadcast %cst_15 : f32 to vector<1x64x128xf32>
      %c0_16 = arith.constant 0 : index
      %c0_17 = arith.constant 0 : index
      %c0_18 = arith.constant 0 : index
      %43 = vector.load %arg4[%c0_16, %c0_17, %c0_18] : memref<1x64x128xf32, #tpu.memory_space<vmem>>, vector<1x64x128xf32>
      tpu.vector_store %arg4[%c0_16, %c0_17, %c0_18], %42 {strides = array<i32>} : memref<1x64x128xf32, #tpu.memory_space<vmem>>, vector<1x64x128xf32>,
    } else {
    }
    %c0 = arith.constant 0 : index
    %c0_1 = arith.constant 0 : index
    %5 = vector.load %arg2[%c0, %c0_1] : memref<64x128xf32, #tpu.memory_space<vmem>>, vector<64x128xf32>
    %c0_2 = arith.constant 0 : index
    %c0_3 = arith.constant 0 : index
    %6 = vector.load %arg3[%c0_2, %c0_3] : memref<64x128xf32, #tpu.memory_space<vmem>>, vector<64x128xf32>
    %cst = arith.constant 0.000000e+00 : f32
    %7 = vector.broadcast %cst : f32 to vector<64x128xf32>
    %8 = arith.maximumf %5, %7 : vector<64x128xf32>
    %9 = arith.mulf %5, %6 : vector<64x128xf32>
    %10 = arith.subf %8, %9 : vector<64x128xf32>
    %11 = math.absf %5 : vector<64x128xf32>
    %cst_4 = arith.constant 0.000000e+00 : f32
    %12 = vector.broadcast %cst_4 : f32 to vector<64x128xf32>
    %13 = arith.subf %12, %11 : vector<64x128xf32>
    %14 = math.exp %13 : vector<64x128xf32>
    %15 = math.log1p %14 : vector<64x128xf32>
    %16 = arith.addf %10, %15 : vector<64x128xf32>
    %cst_5 = arith.constant 0.000000e+00 : f32
    %17 = vector.broadcast %cst_5 : f32 to vector<64x128xf32>
    %18 = arith.subf %17, %16 : vector<64x128xf32>
    %19 = math.exp %18 : vector<64x128xf32>
    %cst_6 = arith.constant 1.000000e+00 : f32
    %20 = vector.broadcast %cst_6 : f32 to vector<64x128xf32>
    %21 = arith.subf %20, %19 : vector<64x128xf32>
    %22 = arith.mulf %21, %21 : vector<64x128xf32>
    %23 = arith.mulf %22, %16 : vector<64x128xf32>
    %c64_i32 = arith.constant 64 : i32
    %24 = arith.muli %1, %c64_i32 : i32
    %25 = tpu.iota {dimensions = array<i32: 0>} : vector<64x1xi32>
    %26 = vector.broadcast %24 : i32 to vector<64x1xi32>
    %27 = arith.addi %26, %25 : vector<64x1xi32>
    %c16_i32 = arith.constant 16 : i32
    %28 = vector.broadcast %c16_i32 : i32 to vector<64x1xi32>
    %29 = arith.cmpi slt, %27, %28 : vector<64x1xi32>
    %cst_7 = arith.constant 0.000000e+00 : f32
    %30 = vector.shape_cast %29 : vector<64x1xi1> to vector<64x1xi1>
    %31 = vector.broadcast %30 : vector<64x1xi1> to vector<64x128xi1>
    %32 = vector.broadcast %cst_7 : f32 to vector<64x128xf32>
    %33 = arith.select %31, %23, %32 : vector<64x128xi1>, vector<64x128xf32>
    %c0_8 = arith.constant 0 : index
    %c0_9 = arith.constant 0 : index
    %c0_10 = arith.constant 0 : index
    %34 = vector.load %arg4[%c0_8, %c0_9, %c0_10] : memref<1x64x128xf32, #tpu.memory_space<vmem>>, vector<1x64x128xf32>
    %35 = vector.shape_cast %34 : vector<1x64x128xf32> to vector<64x128xf32>
    %36 = vector.shape_cast %33 : vector<64x128xf32> to vector<1x64x128xf32>
    %cst_11 = arith.constant dense<0.000000e+00> : vector<64x128xf32>
    %37 = vector.multi_reduction <add>, %36, %cst_11 [0] : vector<1x64x128xf32> to vector<64x128xf32>
    %38 = arith.addf %35, %37 : vector<64x128xf32>
    %c0_12 = arith.constant 0 : index
    %c0_13 = arith.constant 0 : index
    %c0_14 = arith.constant 0 : index
    %39 = vector.load %arg4[%c0_12, %c0_13, %c0_14] : memref<1x64x128xf32, #tpu.memory_space<vmem>>, vector<1x64x128xf32>
    %40 = vector.shape_cast %39 : vector<1x64x128xf32> to vector<64x128xf32>
    %41 = vector.shape_cast %38 : vector<64x128xf32> to vector<1x64x128xf32>
    tpu.vector_store %arg4[%c0_12, %c0_13, %c0_14], %41 {strides = array<i32>} : memref<1x64x128xf32, #tpu.memory_space<vmem>>, vector<1x64x128xf32>,
    return
  }
  func.func @transform_0(%arg0: i32, %arg1: i32) -> (i32, i32) {
    %c1_i32 = arith.constant 1 : i32
    %0 = arith.muli %arg0, %c1_i32 : i32
    %1 = arith.addi %0, %arg1 : i32
    %c0_i32 = arith.constant 0 : i32
    %2 = arith.minsi %1, %c0_i32 : i32
    %c0_i32_0 = arith.constant 0 : i32
    %c0_i32_1 = arith.constant 0 : i32
    return %2, %c0_i32_0 : i32, i32
  }
  func.func @transform_1(%arg0: i32, %arg1: i32) -> (i32, i32) {
    %c1_i32 = arith.constant 1 : i32
    %0 = arith.muli %arg0, %c1_i32 : i32
    %1 = arith.addi %0, %arg1 : i32
    %c0_i32 = arith.constant 0 : i32
    %2 = arith.minsi %1, %c0_i32 : i32
    %c0_i32_0 = arith.constant 0 : i32
    %c0_i32_1 = arith.constant 0 : i32
    return %2, %c0_i32_0 : i32, i32
  }
  func.func @transform_2(%arg0: i32, %arg1: i32) -> (i32, i32, i32) {
    %c0_i32 = arith.constant 0 : i32
    %c0_i32_0 = arith.constant 0 : i32
    %c0_i32_1 = arith.constant 0 : i32
    return %arg0, %c0_i32, %c0_i32_0 : i32, i32, i32
  }
}

</mosaic_0001>

<bundles_post_ra>
// kernel: tpu_custom_call.1
= control target key start
LH: loop header
LB: loop body
LE: loop exit
PB: predicated region body
PF: predicated region fallthrough
CT: control target
= control target key end

     0   :  { %7 = vsyncpa [#allocation3], 0  ;;  %s546_s0 = inlined_call_operand.hbm [shape: f32[16,128], index: 0, kind: input, shape index: {}]   ;;  %s547_s1 = inlined_call_operand.hbm [shape: f32[16,128], index: 1, kind: input, shape index: {}]   ;;  %s548_s2 = inlined_call_operand.hbm [shape: f32[1,64,128], index: 2, kind: output, shape index: {}]  }
   0x1   :  { %8 = vsyncpa [#allocation6], 0 }
   0x2   :  { %9 = vsyncpa [#allocation4], 0 }
   0x3   :  { %20 = vsyncadd [#allocation3], 768  ;;  %s480_s9 = smov [#allocation2]   ;;  %s408_s13 = scalar_lea.hbm %s546_s0, 256 }
   0x4   :  { %s25_s10 = sshll.u32 %s480_s9, 4  ;;  %p409_p0 = scmp.ne.s32.totalorder %s546_s0, %s408_s13  ;;  %s26_s10 = int_to_ptr.vmem [resolvable:$true] %s25_s10 }
   0x5   :  { %p412_p1 = scmp.lt.u32.totalorder %s408_s13, %s546_s0 }
   0x7   :  { %p414_p2 = pnand %p412_p1, %p409_p0 }
   0x9   :  { %417 = shalt.err (!%p414_p2)
}
   0xa   :  { %s418_s18 = scalar_lea.vmem %s26_s10, 256  ;;  %s422_s19 = scalar_lea.vmem %s26_s10, 1024 }
   0xb   :  { %p419_p3 = scmp.ne.s32.totalorder %s26_s10, %s418_s18  ;;  %p423_p4 = scmp.lt.s32.totalorder %s26_s10, %s26_s10 }
   0xc   :  { %p424_p5 = scmp.lt.s32.totalorder %s422_s19, %s418_s18 }
   0xe   :  { %p425_p6 = por %p424_p5, %p423_p4 }
  0x10   :  { %p426_p7 = pnand %p425_p6, %p419_p3 }
  0x12   :  { %429 = shalt.err (!%p426_p7)
}
  0x13   :  { %s481_s20 = smov 128   ;;  %s482_s21 = smov 8  }
  0x14   :  { %31 = dma.hbm_to_vmem [thread:$0]  %s546_s0, 256, %s26_s10, [#allocation3], %s481_s20, %s481_s20, %s482_s21  }
  0x15   :  { %42 = vsyncadd [#allocation6], 768  ;;  %s483_s24 = smov [#allocation5]   ;;  %s430_s28 = scalar_lea.hbm %s547_s1, 256 }
  0x16   :  { %s47_s25 = sshll.u32 %s483_s24, 4  ;;  %p431_p8 = scmp.ne.s32.totalorder %s547_s1, %s430_s28  ;;  %s48_s25 = int_to_ptr.vmem [resolvable:$true] %s47_s25 }
  0x17   :  { %p434_p9 = scmp.lt.u32.totalorder %s430_s28, %s547_s1 }
  0x19   :  { %p436_p10 = pnand %p434_p9, %p431_p8 }
  0x1b   :  { %439 = shalt.err (!%p436_p10)
}
  0x1c   :  { %s440_s5 = scalar_lea.vmem %s48_s25, 256  ;;  %s444_s0 = scalar_lea.vmem %s48_s25, 1024 }
  0x1d   :  { %p441_p11 = scmp.ne.s32.totalorder %s48_s25, %s440_s5  ;;  %p445_p12 = scmp.lt.s32.totalorder %s48_s25, %s48_s25 }
  0x1e   :  { %p446_p13 = scmp.lt.s32.totalorder %s444_s0, %s440_s5 }
  0x20   :  { %p447_p0 = por %p446_p13, %p445_p12 }
  0x22   :  { %p448_p1 = pnand %p447_p0, %p441_p11 }
  0x24   :  { %451 = shalt.err (!%p448_p1)
}
  0x25   :  { %53 = dma.hbm_to_vmem [thread:$0]  %s547_s1, 256, %s48_s25, [#allocation6], %s481_s20, %s481_s20, %s482_s21  }
  0x26   :  { %474 = dma.done.wait [#allocation3], 1024  }
  0x27   :  { %475 = vsyncadd [#allocation3], 4294966272 }
  0x28   :  { %476 = dma.done.wait [#allocation6], 1024  }
  0x29   :  { %477 = vsyncadd [#allocation6], 4294966272  ;;  %v484_v0 = vmov 0.0   ;;  %v85_v1 = vld [vmem:[#allocation2] sm:$0xff]  ;;  %v86_v2 = vld [vmem:[#allocation2 + $0x8] sm:$0xff]  ;;  %s485_s1 = smov [#allocation7]  }
  0x2a   :  { %362 = vst [vmem:[#allocation7 + $0x10] sm:$0xff] %v484_v0  ;;  %363 = vst [vmem:[#allocation7 + $0x18] sm:$0xff] %v484_v0  ;;  %v125_v3 = vand.u32 2147483647, %v85_v1  ;;  %v126_v4 = vand.u32 2147483647, %v86_v2 }
  0x2b   :  { %364 = vst [vmem:[#allocation7 + $0x20] sm:$0xff] %v484_v0  ;;  %365 = vst [vmem:[#allocation7 + $0x28] sm:$0xff] %v484_v0  ;;  %v93_v15 = vld [vmem:[#allocation5] sm:$0xff]  ;;  %v94_v16 = vld [vmem:[#allocation5 + $0x8] sm:$0xff]  ;;  %v101_v18 = vmax.f32 %v85_v1, 0.0  ;;  %v102_v22 = vmax.f32 %v86_v2, 0.0 }
  0x2c   :  { %366 = vst [vmem:[#allocation7 + $0x30] sm:$0xff] %v484_v0  ;;  %367 = vst [vmem:[#allocation7 + $0x38] sm:$0xff] %v484_v0  ;;  %v133_v5 = vsub.f32 0.0, %v125_v3  ;;  %v134_v6 = vsub.f32 0.0, %v126_v4  ;;  %v109_v19 = vmul.f32 %v93_v15, %v85_v1  ;;  %v110_v23 = vmul.f32 %v94_v16, %v86_v2  ;;  %s373_s8 = sshll.u32 %s485_s1, 4  ;;  %s374_s8 = int_to_ptr.vmem [resolvable:$true] %s373_s8 }
  0x2d   :  { %s452_s9 = scalar_lea.vmem %s374_s8, 1024  ;;  %p457_p3 = scmp.lt.s32.totalorder %s374_s8, %s374_s8 }
  0x2e   :  { %v141_v7 = vmul.f32 1.442695, %v133_v5  ;;  %v143_v8 = vmul.f32 1.442695, %v134_v6  ;;  %v117_v27 = vsub.f32 %v101_v18, %v109_v19  ;;  %v118_v31 = vsub.f32 %v102_v22, %v110_v23  ;;  %p453_p2 = scmp.ne.s32.totalorder %s374_s8, %s452_s9  ;;  %p458_p4 = scmp.lt.s32.totalorder %s452_s9, %s452_s9 }
  0x30   :  { %396 = vpow2.f32 %v141_v7  ;;  %p459_p5 = por %p458_p4, %p457_p3 }
  0x31   :  { %398 = vpow2.f32 %v143_v8 }
  0x32   :  { %p460_p6 = pnand %p459_p5, %p453_p2 }
  0x3a   :  { %v397_v9 = vpop.eup %396 }
  0x3b   :  { %v399_v10 = vpop.eup %398  ;;  %v157_v11 = vadd.f32 1.0, %v397_v9  ;;  %v160_v13 = vmul.f32 -0.5, %v397_v9  ;;  %v163_v20 = vand.u32 2147483647, %v397_v9 }
  0x3c   :  { %v166_v12 = vadd.f32 1.0, %v399_v10  ;;  %v169_v14 = vmul.f32 -0.5, %v399_v10  ;;  %v172_v24 = vand.u32 2147483647, %v399_v10 }
  0x3d   :  { %400 = vlog2.f32 %v157_v11  ;;  %v161_v17 = vadd.f32 1.0, %v160_v13  ;;  %vm164_vm0 = vcmp.lt.f32.partialorder %v163_v20, 0.0004427343 }
  0x3e   :  { %402 = vlog2.f32 %v166_v12  ;;  %v170_v21 = vadd.f32 1.0, %v169_v14  ;;  %vm173_vm1 = vcmp.lt.f32.partialorder %v172_v24, 0.0004427343 }
  0x3f   :  { %v162_v25 = vmul.f32 %v397_v9, %v161_v17 }
  0x40   :  { %v171_v28 = vmul.f32 %v399_v10, %v170_v21 }
  0x47   :  { %v401_v26 = vpop.eup %400 }
  0x48   :  { %v403_v29 = vpop.eup %402  ;;  %v159_v30 = vmul.f32 0.6931472, %v401_v26 }
  0x49   :  { %v168_v32 = vmul.f32 0.6931472, %v403_v29 }
  0x4a   :  { %v165_v33 = vsel %vm164_vm0, %v162_v25, %v159_v30 }
  0x4b   :  { %v229_v34 = vadd.f32 %v165_v33, %v117_v27  ;;  %v174_v35 = vsel %vm173_vm1, %v171_v28, %v168_v32 }
  0x4c   :  { %v230_v36 = vadd.f32 %v174_v35, %v118_v31 }
  0x4d   :  { %v237_v37 = vsub.f32 0.0, %v229_v34 }
  0x4e   :  { %v238_v38 = vsub.f32 0.0, %v230_v36 }
  0x4f   :  { %v245_v39 = vmul.f32 1.442695, %v237_v37 }
  0x50   :  { %v247_v40 = vmul.f32 1.442695, %v238_v38 }
  0x51   :  { %404 = vpow2.f32 %v245_v39 }
  0x52   :  { %406 = vpow2.f32 %v247_v40 }
  0x5b   :  { %v405_v41 = vpop.eup %404 }
  0x5c   :  { %v407_v42 = vpop.eup %406  ;;  %v261_v43 = vsub.f32 1.0, %v405_v41 }
  0x5d   :  { %v262_v44 = vsub.f32 1.0, %v407_v42 }
  0x5e   :  { %v269_v45 = vmul.f32 %v261_v43, %v261_v43 }
  0x5f   :  { %v270_v46 = vmul.f32 %v262_v44, %v262_v44 }
  0x60   :  { %v277_v47 = vmul.f32 %v269_v45, %v229_v34 }
  0x61   :  { %v278_v48 = vmul.f32 %v270_v46, %v230_v36 }
  0x62   :  { %360 = vst [vmem:[#allocation7] sm:$0xff] %v277_v47 }
  0x63   :  { %361 = vst [vmem:[#allocation7 + $0x8] sm:$0xff] %v278_v48 }
  0x64   :  { %463 = shalt.err (!%p460_p6)
}
  0x65   :  { %s464_s12 = scalar_lea.hbm %s548_s2, 1024 }
  0x66   :  { %p465_p7 = scmp.ne.s32.totalorder %s548_s2, %s464_s12  ;;  %p468_p8 = scmp.lt.u32.totalorder %s464_s12, %s548_s2 }
  0x68   :  { %p470_p9 = pnand %p468_p8, %p465_p7 }
  0x6a   :  { %473 = shalt.err (!%p470_p9)
}
  0x6b   :  { %379 = dma.vmem_to_hbm [thread:$0]  %s374_s8, 1024, %s548_s2, [#allocation4], %s481_s20, %s481_s20, %s482_s21  }
  0x6c   :  { %478 = dma.done.wait [#allocation4], 1024  }
  0x6d   :  { %479 = vsyncadd [#allocation4], 4294966272 }
  0x6e   :  { %383 = vsyncpa [#allocation3], 1 }
  0x6f   :  { %384 = vsyncpa [#allocation6], 1 }
  0x70   :  { %385 = vsyncpa [#allocation4], 1 }

</bundles_post_ra>
